<compile_context>
chip_gen: v7x
topology: tpu7x:2x2x1
jax: 0.10.0
libtpu: 0.0.40
codegen_flags: <defaults>
</compile_context>

<pallas_src>
import jax
import jax.numpy as jnp
from jax.experimental import pallas as pl
from jax.experimental.pallas import tpu as pltpu


_LANE = 128                  # TPU lane width
_BOXES_PER_ROW = _LANE // 4  # 32 boxes per 128-lane row (4 coords per box)
_SMALL_N_BYPASS = 8192       # below this many boxes, pure-jnp path (overhead-bound)


def _round_up(x: int, m: int) -> int:
    return ((x + m - 1) // m) * m


def _cdiv(a: int, b: int) -> int:
    return -(-a // b)


def _make_box_kernel(inv_w: float, inv_h: float):
    """xyxy -> normalized cxcywh on a lane-dense (R, 128) block.

    Each 128-lane row holds 32 boxes laid out [x0, y0, x1, y1] * 32.
    Output keeps the same layout: [cx/w, cy/h, bw/w, bh/h] * 32.
    inv_w / inv_h are compile-time constants closed over by the kernel.
    """
    half_w = 0.5 * inv_w
    half_h = 0.5 * inv_h

    def kernel(b_ref, o_ref):
        b = b_ref[...]                                   # (R, 128) f32, full-block load
        # XLU lane rotations align the partner coordinate under every lane.
        # (jnp.roll semantics: out[i] = x[i - shift]; shift=126 == -2 mod 128.)
        fwd = pltpu.roll(b, shift=_LANE - 2, axis=1)     # fwd[i] = b[i+2]: x1,y1 under x0,y0
        bwd = pltpu.roll(b, shift=2, axis=1)             # bwd[i] = b[i-2]: x0,y0 under x1,y1
        # Wrap-around lanes only land on the unselected branch -> harmless.

        # One-vreg per-lane constants (sublane-broadcast in the ops below).
        m = jax.lax.broadcasted_iota(jnp.int32, (1, _LANE), 1) & 3   # lane % 4
        is_lo = m < 2                                                # lanes holding x0 / y0
        scale = jnp.where(m == 0, half_w,
                jnp.where(m == 1, half_h,
                jnp.where(m == 2, inv_w, inv_h))).astype(jnp.float32)

        mixed = jnp.where(is_lo, b + fwd, b - bwd)       # [x0+x1, y0+y1, x1-x0, y1-y0]
        o_ref[...] = mixed * scale                       # full-block unmasked store

    return kernel


def box_xyxy_to_cxcywh_normalized(boxes, image_shape, *, use_kernel=None,
                                  max_tile_rows: int = 2048):
    """boxes [N,4] xyxy -> normalized cxcywh [N,4] float32.

    use_kernel: None = auto (Pallas kernel only for large N), True/False = force.
    max_tile_rows: rows of 128 lanes per grid step (2048 rows == 1 MiB block).
    """
    n = int(boxes.shape[0])

    # Exact module semantics: w = shape[-2]-1, h = shape[-1]-1; divide by
    # (w, h, w, h).  Baked in as reciprocal constants (<=1 ulp vs. divide).
    w = float(image_shape[-2] - 1)
    h = float(image_shape[-1] - 1)
    inv_w = (1.0 / w) if w != 0.0 else float("inf")
    inv_h = (1.0 / h) if h != 0.0 else float("inf")

    b32 = boxes.astype(jnp.float32)
    if n == 0:
        return b32

    if use_kernel is None:
        use_kernel = n >= _SMALL_N_BYPASS

    if not use_kernel:
        # Small-N bypass: launch + pad/reshape overhead dwarfs ~16N flops; let XLA fuse.
        x0, y0, x1, y1 = b32[:, 0], b32[:, 1], b32[:, 2], b32[:, 3]
        return jnp.stack([(x0 + x1) * (0.5 * inv_w),
                          (y0 + y1) * (0.5 * inv_h),
                          (x1 - x0) * inv_w,
                          (y1 - y0) * inv_h], axis=-1)

    # Lane-dense layout with no transpose: pad N to a multiple of 32 boxes and
    # view row-major as (rows, 128).  The reshape is metadata-only.
    n_pad = _round_up(n, _BOXES_PER_ROW)
    if n_pad != n:
        b32 = jnp.pad(b32, ((0, n_pad - n), (0, 0)))
    rows = n_pad // _BOXES_PER_ROW
    flat = b32.reshape(rows, _LANE)

    # Tile sizing: one big block if it fits; otherwise an even number of big
    # steps so v7x's two TensorCores split the "parallel" grid.  Ragged last
    # block (rows % tile_rows != 0) is handled by Pallas edge masking.
    max_tile_rows = max(8, (max_tile_rows // 8) * 8)
    if rows <= max_tile_rows:
        tile_rows = rows                      # full array == one block (shape rule exempt)
    else:
        n_steps = _cdiv(rows, max_tile_rows)
        if n_steps % 2:
            n_steps += 1                      # even #steps -> both v7x TCs busy
        tile_rows = _round_up(_cdiv(rows, n_steps), 8)
    grid_len = _cdiv(rows, tile_rows)

    out_flat = pl.pallas_call(
        _make_box_kernel(inv_w, inv_h),
        out_shape=jax.ShapeDtypeStruct((rows, _LANE), jnp.float32),
        grid=(grid_len,),
        in_specs=[pl.BlockSpec((tile_rows, _LANE), lambda i: (i, 0))],
        out_specs=pl.BlockSpec((tile_rows, _LANE), lambda i: (i, 0)),
        compiler_params=pltpu.CompilerParams(
            dimension_semantics=("parallel",),
        ),
    )(flat)

    out = out_flat.reshape(n_pad, 4)
    return out if n_pad == n else out[:n]


def box_xyxy_to_cxcywh_module(image, target=None):
    """Forward pass matching BoxXYXYToCXCYWH.forward."""
    # Host-side control flow, identical to the PyTorch module's early return.
    if target is None or target["boxes"].shape[0] == 0:
        return image, target
    new_target = dict(target)
    new_target["boxes"] = box_xyxy_to_cxcywh_normalized(target["boxes"], image.shape)
    return image, new_target


def _reference(boxes, image_shape):
    """Pure-JAX reference (mirrors the torch module, including the divide)."""
    w = float(image_shape[-2] - 1)
    h = float(image_shape[-1] - 1)
    b = boxes.astype(jnp.float32)
    x0, y0, x1, y1 = b[:, 0], b[:, 1], b[:, 2], b[:, 3]
    cxcywh = jnp.stack([(x0 + x1) * 0.5, (y0 + y1) * 0.5, x1 - x0, y1 - y0], axis=-1)
    return cxcywh / jnp.array([w, h, w, h], dtype=jnp.float32)


if __name__ == "__main__":
    key = jax.random.PRNGKey(0)
    k_img, k_xy, k_wh, k_xy2, k_wh2 = jax.random.split(key, 5)

    # image: NCHW, small shapes
    B, C, H, W = 2, 4, 16, 16
    image = jax.random.normal(k_img, (B, C, H, W), dtype=jnp.float32)

    def make_boxes(kxy, kwh, n):
        xy0 = jax.random.uniform(kxy, (n, 2), minval=0.0, maxval=7.0)
        wh = jax.random.uniform(kwh, (n, 2), minval=1.0, maxval=7.0)
        return jnp.concatenate([xy0, xy0 + wh], axis=-1).astype(jnp.float32)

    # 1) Module forward, common detection case (small-N pure-jnp bypass).
    boxes_small = make_boxes(k_xy, k_wh, 8)
    out_image, out_target = box_xyxy_to_cxcywh_module(image, {"boxes": boxes_small})
    out_small = jax.block_until_ready(out_target["boxes"])
    assert out_small.shape == (8, 4) and out_small.dtype == jnp.float32
    assert jnp.allclose(out_small, _reference(boxes_small, image.shape),
                        atol=1e-6, rtol=1e-5)
    assert jnp.array_equal(out_image, image)      # image passes through unchanged

    # 2) Pallas kernel path, single full block (N=1000 -> pad 1024 -> 32 rows).
    boxes_mid = make_boxes(k_xy2, k_wh2, 1000)
    out_mid = jax.block_until_ready(
        box_xyxy_to_cxcywh_normalized(boxes_mid, image.shape, use_kernel=True))
    assert out_mid.shape == (1000, 4) and out_mid.dtype == jnp.float32
    assert jnp.allclose(out_mid, _reference(boxes_mid, image.shape),
                        atol=1e-6, rtol=1e-5)

    # 3) Pallas kernel path, ragged tail (N=5 -> one row, 27 padded boxes sliced off).
    boxes_tiny = boxes_small[:5]
    out_tiny = jax.block_until_ready(
        box_xyxy_to_cxcywh_normalized(boxes_tiny, image.shape, use_kernel=True))
    assert jnp.allclose(out_tiny, _reference(boxes_tiny, image.shape),
                        atol=1e-6, rtol=1e-5)

    # 4) Pallas kernel path, multi-step pipelined grid (small tile to exercise it).
    out_grid = jax.block_until_ready(
        box_xyxy_to_cxcywh_normalized(boxes_mid, image.shape,
                                      use_kernel=True, max_tile_rows=8))
    assert jnp.allclose(out_grid, _reference(boxes_mid, image.shape),
                        atol=1e-6, rtol=1e-5)

    # 5) Empty-boxes fast path: identity (no kernel launch).
    empty_target = {"boxes": jnp.zeros((0, 4), dtype=jnp.float32)}
    img2, tgt2 = box_xyxy_to_cxcywh_module(image, empty_target)
    assert tgt2["boxes"].shape[0] == 0
    assert jnp.array_equal(img2, image)

    print("KERNEL_OK")
</pallas_src>

<mosaic_0001>
module attributes {stable_mosaic.version = 11 : i64} {
  func.func @kernel(%arg0: i32, %arg1: memref<32x128xf32, #tpu.memory_space<vmem>>, %arg2: memref<32x128xf32, #tpu.memory_space<vmem>>) attributes {dimension_semantics = [#tpu.dimension_semantics<parallel>], iteration_bounds = array<i64: 1>, scalar_prefetch = 0 : i64, scratch_operands = 0 : i64, tpu.core_type = #tpu.core_type<tc>, window_params = [{transform_indices = @transform_0, window_bounds = array<i64: 32, 128>}, {transform_indices = @transform_1, window_bounds = array<i64: 32, 128>}]} {
    %c0 = arith.constant 0 : index
    %c0_0 = arith.constant 0 : index
    %0 = vector.load %arg1[%c0, %c0_0] : memref<32x128xf32, #tpu.memory_space<vmem>>, vector<32x128xf32>
    %c126_i32 = arith.constant 126 : i32
    %1 = tpu.dynamic_rotate %0 by %c126_i32 dim 1 : vector<32x128xf32>, i32 -> vector<32x128xf32>
    %c2_i32 = arith.constant 2 : i32
    %2 = tpu.dynamic_rotate %0 by %c2_i32 dim 1 : vector<32x128xf32>, i32 -> vector<32x128xf32>
    %3 = tpu.iota {dimensions = array<i32: 1>} : vector<1x128xi32>
    %c3_i32 = arith.constant 3 : i32
    %4 = vector.broadcast %c3_i32 : i32 to vector<1x128xi32>
    %5 = arith.andi %3, %4 : vector<1x128xi32>
    %c2_i32_1 = arith.constant 2 : i32
    %6 = vector.broadcast %c2_i32_1 : i32 to vector<1x128xi32>
    %7 = arith.cmpi slt, %5, %6 : vector<1x128xi32>
    %c0_i32 = arith.constant 0 : i32
    %8 = vector.broadcast %c0_i32 : i32 to vector<1x128xi32>
    %9 = arith.cmpi eq, %5, %8 : vector<1x128xi32>
    %c1_i32 = arith.constant 1 : i32
    %10 = vector.broadcast %c1_i32 : i32 to vector<1x128xi32>
    %11 = arith.cmpi eq, %5, %10 : vector<1x128xi32>
    %c2_i32_2 = arith.constant 2 : i32
    %12 = vector.broadcast %c2_i32_2 : i32 to vector<1x128xi32>
    %13 = arith.cmpi eq, %5, %12 : vector<1x128xi32>
    %cst = arith.constant 0.0666666701 : f32
    %cst_3 = arith.constant 0.0666666701 : f32
    %14 = vector.broadcast %cst : f32 to vector<1x128xf32>
    %15 = vector.broadcast %cst_3 : f32 to vector<1x128xf32>
    %16 = arith.select %13, %14, %15 : vector<1x128xi1>, vector<1x128xf32>
    %cst_4 = arith.constant 0.0333333351 : f32
    %17 = vector.broadcast %cst_4 : f32 to vector<1x128xf32>
    %18 = arith.select %11, %17, %16 : vector<1x128xi1>, vector<1x128xf32>
    %cst_5 = arith.constant 0.0333333351 : f32
    %19 = vector.broadcast %cst_5 : f32 to vector<1x128xf32>
    %20 = arith.select %9, %19, %18 : vector<1x128xi1>, vector<1x128xf32>
    %21 = arith.addf %0, %1 : vector<32x128xf32>
    %22 = arith.subf %0, %2 : vector<32x128xf32>
    %23 = vector.shape_cast %7 : vector<1x128xi1> to vector<1x128xi1>
    %24 = vector.broadcast %23 : vector<1x128xi1> to vector<32x128xi1>
    %25 = arith.select %24, %21, %22 : vector<32x128xi1>, vector<32x128xf32>
    %26 = vector.broadcast %20 : vector<1x128xf32> to vector<32x128xf32>
    %27 = arith.mulf %25, %26 : vector<32x128xf32>
    %c0_6 = arith.constant 0 : index
    %c0_7 = arith.constant 0 : index
    %28 = vector.load %arg2[%c0_6, %c0_7] : memref<32x128xf32, #tpu.memory_space<vmem>>, vector<32x128xf32>
    tpu.vector_store %arg2[%c0_6, %c0_7], %27 {strides = array<i32>} : memref<32x128xf32, #tpu.memory_space<vmem>>, vector<32x128xf32>,
    return
  }
  func.func @transform_0(%arg0: i32) -> (i32, i32) {
    %c0_i32 = arith.constant 0 : i32
    %c0_i32_0 = arith.constant 0 : i32
    return %arg0, %c0_i32 : i32, i32
  }
  func.func @transform_1(%arg0: i32) -> (i32, i32) {
    %c0_i32 = arith.constant 0 : i32
    %c0_i32_0 = arith.constant 0 : i32
    return %arg0, %c0_i32 : i32, i32
  }
}

</mosaic_0001>

<bundles_post_ra>
// kernel: tpu_custom_call.1
= control target key start
LH: loop header
LB: loop body
LE: loop exit
PB: predicated region body
PF: predicated region fallthrough
CT: control target
= control target key end

     0   :  { %6 = vsyncpa [#allocation3], 0  ;;  %s196_s0 = inlined_call_operand.hbm [shape: f32[32,128], index: 0, kind: input, shape index: {}]   ;;  %s197_s1 = inlined_call_operand.hbm [shape: f32[32,128], index: 1, kind: output, shape index: {}]  }
   0x1   :  { %7 = vsyncpa [#allocation4], 0  ;;  %s145_s6 = smov [#allocation2]   ;;  %s97_s10 = scalar_lea.hbm %s196_s0, 512 }
   0x2   :  { %s13_s7 = sshll.u32 %s145_s6, 4  ;;  %p98_p0 = scmp.ne.s32.totalorder %s196_s0, %s97_s10  ;;  %s14_s7 = int_to_ptr.vmem [resolvable:$true] %s13_s7 }
   0x3   :  { %p101_p1 = scmp.lt.u32.totalorder %s97_s10, %s196_s0 }
   0x5   :  { %p103_p2 = pnand %p101_p1, %p98_p0 }
   0x7   :  { %106 = shalt.err (!%p103_p2)
}
   0x8   :  { %s107_s15 = scalar_lea.vmem %s14_s7, 512  ;;  %p112_p4 = scmp.lt.s32.totalorder %s14_s7, %s14_s7 }
   0x9   :  { %p108_p3 = scmp.ne.s32.totalorder %s14_s7, %s107_s15  ;;  %p113_p5 = scmp.lt.s32.totalorder %s107_s15, %s107_s15 }
   0xb   :  { %p114_p6 = por %p113_p5, %p112_p4 }
   0xd   :  { %p115_p7 = pnand %p114_p6, %p108_p3 }
   0xf   :  { %118 = shalt.err (!%p115_p7)
}
  0x10   :  { %s146_s16 = smov 128   ;;  %s147_s17 = smov 8  }
  0x11   :  { %19 = dma.hbm_to_vmem [thread:$0]  %s196_s0, 512, %s14_s7, [#allocation3], %s146_s16, %s146_s16, %s147_s17  }
  0x12   :  { %141 = dma.done.wait [#allocation3], 512  }
  0x13   :  { %142 = vsyncadd [#allocation3], 4294966784  ;;  %v25_v0 = vld [vmem:[#allocation2 + $0x10] sm:$0xff]  ;;  %v23_v1 = vld [vmem:[#allocation2] sm:$0xff]  ;;  %s148_s20 = smov 126   ;;  %s149_s21 = smov 2   ;;  %v43_v4 = vlaneseq }
  0x14   :  { %31 = vrot.lane.b32.xlu1 %v25_v0, %s148_s20  ;;  %27 = vrot.lane.b32.xlu0 %v23_v1, %s148_s20  ;;  %v26_v2 = vld [vmem:[#allocation2 + $0x18] sm:$0xff]  ;;  %v24_v3 = vld [vmem:[#allocation2 + $0x8] sm:$0xff]  ;;  %v150_v11 = vmov 0.06666667   ;;  %s151_s0 = smov [#allocation5]  }
  0x15   :  { %v44_v5 = vand.u32 127, %v43_v4  ;;  %s78_s22 = sshll.u32 %s151_s0, 4  ;;  %s79_s22 = int_to_ptr.vmem [resolvable:$true] %s78_s22 }
  0x16   :  { %s119_s23 = scalar_lea.vmem %s79_s22, 512  ;;  %p124_p9 = scmp.lt.s32.totalorder %s79_s22, %s79_s22 }
  0x17   :  { %v45_v6 = vand.u32 3, %v44_v5  ;;  %p120_p8 = scmp.ne.s32.totalorder %s79_s22, %s119_s23  ;;  %p125_p10 = scmp.lt.s32.totalorder %s119_s23, %s119_s23 }
  0x18   :  { %33 = vrot.lane.b32.xlu1 %v26_v2, %s148_s20  ;;  %29 = vrot.lane.b32.xlu0 %v24_v3, %s148_s20 }
  0x19   :  { %vm48_vm0 = vcmp.eq.s32.totalorder %v45_v6, 1  ;;  %vm47_vm1 = vcmp.eq.s32.totalorder %v45_v6, 0  ;;  %vm46_vm2 = vcmp.lt.s32.totalorder %v45_v6, 2  ;;  %p126_p11 = por %p125_p10, %p124_p9 }
  0x1a   :  { %v49_v12 = vsel %vm48_vm0, 0.033333335, %v150_v11 }
  0x1b   :  { %v50_v13 = vsel %vm47_vm1, 0.033333335, %v49_v12  ;;  %p127_p12 = pnand %p126_p11, %p120_p8 }
  0x1c   :  { %37 = vrot.lane.b32.xlu1 %v24_v3, %s149_s21  ;;  %35 = vrot.lane.b32.xlu0 %v23_v1, %s149_s21 }
  0x20   :  { %41 = vrot.lane.b32.xlu1 %v26_v2, %s149_s21  ;;  %39 = vrot.lane.b32.xlu0 %v25_v0, %s149_s21 }
  0x86   :  { %v32_v7 = vpop.permute.xlu1 %31  ;;  %v28_v8 = vpop.permute.xlu0 %27 }
  0x87   :  { %v51_v16 = vadd.f32 %v28_v8, %v23_v1  ;;  %v53_v26 = vadd.f32 %v32_v7, %v25_v0 }
  0x8a   :  { %v34_v9 = vpop.permute.xlu1 %33  ;;  %v30_v10 = vpop.permute.xlu0 %29 }
  0x8b   :  { %v52_v17 = vadd.f32 %v30_v10, %v24_v3  ;;  %v54_v27 = vadd.f32 %v34_v9, %v26_v2 }
  0x8e   :  { %v38_v14 = vpop.permute.xlu1 %37  ;;  %v36_v15 = vpop.permute.xlu0 %35 }
  0x8f   :  { %v56_v18 = vsub.f32 %v24_v3, %v38_v14  ;;  %v55_v19 = vsub.f32 %v23_v1, %v36_v15 }
  0x91   :  { %v62_v20 = vsel %vm46_vm2, %v52_v17, %v56_v18  ;;  %v61_v21 = vsel %vm46_vm2, %v51_v16, %v55_v19 }
  0x92   :  { %v66_v22 = vmul.f32 %v62_v20, %v50_v13  ;;  %v65_v23 = vmul.f32 %v61_v21, %v50_v13  ;;  %v42_v24 = vpop.permute.xlu1 %41  ;;  %v40_v25 = vpop.permute.xlu0 %39 }
  0x93   :  { %v58_v28 = vsub.f32 %v26_v2, %v42_v24  ;;  %v57_v29 = vsub.f32 %v25_v0, %v40_v25 }
  0x94   :  { %70 = vst [vmem:[#allocation5 + $0x8] sm:$0xff] %v66_v22  ;;  %69 = vst [vmem:[#allocation5] sm:$0xff] %v65_v23 }
  0x95   :  { %v64_v30 = vsel %vm46_vm2, %v54_v27, %v58_v28  ;;  %v63_v31 = vsel %vm46_vm2, %v53_v26, %v57_v29 }
  0x96   :  { %v68_v32 = vmul.f32 %v64_v30, %v50_v13  ;;  %v67_v33 = vmul.f32 %v63_v31, %v50_v13 }
  0x98   :  { %72 = vst [vmem:[#allocation5 + $0x18] sm:$0xff] %v68_v32  ;;  %71 = vst [vmem:[#allocation5 + $0x10] sm:$0xff] %v67_v33 }
  0x99   :  { %130 = shalt.err (!%p127_p12)
}
  0x9a   :  { %s131_s26 = scalar_lea.hbm %s197_s1, 512 }
  0x9b   :  { %p132_p13 = scmp.ne.s32.totalorder %s197_s1, %s131_s26  ;;  %p135_p0 = scmp.lt.u32.totalorder %s131_s26, %s197_s1 }
  0x9d   :  { %p137_p1 = pnand %p135_p0, %p132_p13 }
  0x9f   :  { %140 = shalt.err (!%p137_p1)
}
  0xa0   :  { %84 = dma.vmem_to_hbm [thread:$0]  %s79_s22, 512, %s197_s1, [#allocation4], %s146_s16, %s146_s16, %s147_s17  }
  0xa1   :  { %143 = dma.done.wait [#allocation4], 512  }
  0xa2   :  { %144 = vsyncadd [#allocation4], 4294966784 }
  0xa3   :  { %88 = vsyncpa [#allocation3], 1 }
  0xa4   :  { %89 = vsyncpa [#allocation4], 1 }

</bundles_post_ra>
